<compile_context>
chip_gen: v6e
topology: v6e:2x2x1
jax: 0.10.0
libtpu: 0.0.40
codegen_flags: <defaults>
</compile_context>

<pallas_src>
import functools

import jax
import jax.numpy as jnp
from jax import lax
from jax.experimental import pallas as pl
from jax.experimental.pallas import tpu as pltpu


def _round_up(x, m):
    return ((x + m - 1) // m) * m


def _grpo_mla_kernel(x_ref,        # (S*B_pad, Din_pad)   VMEM  time-major input
                     w_in_ref,     # (Din_pad, H_pad)     VMEM
                     b_in_ref,     # (1, H_pad)           VMEM
                     m_ref,        # (H_pad, H_pad)       VMEM
                     w_head_ref,   # (H_pad, HEAD_pad)    VMEM  [W_fc | W_pol | 0]
                     b_head_ref,   # (1, HEAD_pad)        VMEM  [b_fc | b_pol | 0]
                     out_ref,      # (B_pad, HEAD_pad)    VMEM out (lane-dense)
                     corr_ref,     # (S*B_pad, H_pad)     VMEM scratch
                     *, seq_len, batch_pad):
    # 1) Input projection hoisted out of the recurrence: one well-shaped GEMM.
    corr_ref[...] = (
        jnp.dot(x_ref[...], w_in_ref[...], preferred_element_type=jnp.float32)
        + b_in_ref[...])

    m = m_ref[...]

    # 2) Serial recurrence; h lives in vregs (loop carry), loop fully unrolled.
    def body(t, h):
        row = pl.multiple_of(t * batch_pad, batch_pad)
        corr_t = corr_ref[pl.ds(row, batch_pad), :]          # (B_pad, H_pad)
        mh = jnp.dot(h, m, preferred_element_type=jnp.float32)
        return jnp.maximum(mh + corr_t, 0.0)                 # ReLU
        # TODO(synk): nn.Dropout skipped (identity in eval mode).

    h0 = jnp.zeros((batch_pad, m_ref.shape[0]), jnp.float32)
    h = lax.fori_loop(0, seq_len, body, h0, unroll=True)

    # 3) Fused, lane-dense output head: forecast and policy in one matmul/store.
    out_ref[...] = (
        jnp.dot(h, w_head_ref[...], preferred_element_type=jnp.float32)
        + b_head_ref[...])


def grpo_mla_forward(x, params):
    """x: (batch, seq_len, input_dim) float32. Returns (forecast, policy_value)."""
    batch, seq_len, input_dim = x.shape
    hidden = params["M"].shape[0]
    num_products = params["w_fc"].shape[1]

    f32 = jnp.float32
    B_pad = _round_up(batch, 8)          # sublane multiple
    Din_pad = _round_up(input_dim, 128)  # lane multiple
    H_pad = _round_up(hidden, 128)       # lane multiple
    head = num_products + 1              # forecast ++ policy
    HEAD_pad = _round_up(head, 128)      # lane-dense fused head width

    # Time-major, zero-padded input as one 2-D slab: (S * B_pad, Din_pad).
    # (For large S*B this transpose/pad would move into a time-chunked grid.)
    xp = jnp.zeros((seq_len, B_pad, Din_pad), f32)
    xp = xp.at[:, :batch, :input_dim].set(jnp.transpose(x, (1, 0, 2)).astype(f32))
    xp = xp.reshape(seq_len * B_pad, Din_pad)

    # Zero-padded weights (stored (in, out), i.e. transposed vs. nn.Linear).
    w_in = jnp.zeros((Din_pad, H_pad), f32).at[:input_dim, :hidden].set(params["w_in"])
    b_in = jnp.zeros((1, H_pad), f32).at[:, :hidden].set(params["b_in"])
    m = jnp.zeros((H_pad, H_pad), f32).at[:hidden, :hidden].set(params["M"])

    # Fused output head: [W_fc | W_pol], [b_fc | b_pol], padded to 128 lanes.
    w_head = jnp.zeros((H_pad, HEAD_pad), f32)
    w_head = w_head.at[:hidden, :num_products].set(params["w_fc"])
    w_head = w_head.at[:hidden, num_products:head].set(params["w_pol"])
    b_head = jnp.zeros((1, HEAD_pad), f32)
    b_head = b_head.at[:, :num_products].set(params["b_fc"])
    b_head = b_head.at[:, num_products:head].set(params["b_pol"])

    kernel = functools.partial(_grpo_mla_kernel, seq_len=seq_len, batch_pad=B_pad)

    full = lambda shape: pl.BlockSpec(shape, lambda: tuple(0 for _ in shape))

    out = pl.pallas_call(
        kernel,
        out_shape=jax.ShapeDtypeStruct((B_pad, HEAD_pad), f32),
        grid_spec=pltpu.PrefetchScalarGridSpec(
            num_scalar_prefetch=0,
            grid=(),
            in_specs=[
                full(xp.shape),
                full(w_in.shape),
                full(b_in.shape),
                full(m.shape),
                full(w_head.shape),
                full(b_head.shape),
            ],
            out_specs=full((B_pad, HEAD_pad)),
            scratch_shapes=[pltpu.VMEM((seq_len * B_pad, H_pad), f32)],
        ),
    )(xp, w_in, b_in, m, w_head, b_head)

    forecast = out[:batch, :num_products]
    policy = out[:batch, num_products:head]
    return forecast, policy


def init_params(key, input_dim, hidden_dim, num_products):
    """Deterministic synthetic parameters. Weights stored as (in, out)."""
    k = jax.random.split(key, 7)
    scale = 0.1
    return {
        "w_in": scale * jax.random.normal(k[0], (input_dim, hidden_dim), jnp.float32),
        "b_in": scale * jax.random.normal(k[1], (1, hidden_dim), jnp.float32),
        "M":    scale * jax.random.normal(k[2], (hidden_dim, hidden_dim), jnp.float32),
        "w_fc": scale * jax.random.normal(k[3], (hidden_dim, num_products), jnp.float32),
        "b_fc": scale * jax.random.normal(k[4], (1, num_products), jnp.float32),
        "w_pol": scale * jax.random.normal(k[5], (hidden_dim, 1), jnp.float32),
        "b_pol": scale * jax.random.normal(k[6], (1, 1), jnp.float32),
    }


def reference_forward(x, params):
    """Pure-JAX reference of the PyTorch forward (eval mode)."""
    batch, seq_len, _ = x.shape
    hidden = params["M"].shape[0]
    h = jnp.zeros((batch, hidden), jnp.float32)
    for t in range(seq_len):
        corr = x[:, t, :] @ params["w_in"] + params["b_in"]
        h = jnp.maximum(h @ params["M"] + corr, 0.0)
    forecast = h @ params["w_fc"] + params["b_fc"]
    policy = h @ params["w_pol"] + params["b_pol"]
    return forecast, policy


if __name__ == "__main__":
    # Small shapes consistent with the module's forward(x: [B, S, input_dim]).
    batch, seq_len, input_dim = 2, 8, 4
    hidden_dim, num_products = 32, 5

    key = jax.random.PRNGKey(0)
    kx, kp = jax.random.split(key)
    x = jax.random.normal(kx, (batch, seq_len, input_dim), jnp.float32)
    params = init_params(kp, input_dim, hidden_dim, num_products)

    forecast, policy = grpo_mla_forward(x, params)
    forecast = jax.block_until_ready(forecast)
    policy = jax.block_until_ready(policy)

    ref_forecast, ref_policy = reference_forward(x, params)
    assert forecast.shape == (batch, num_products)
    assert policy.shape == (batch, 1)
    assert jnp.allclose(forecast, ref_forecast, atol=1e-5, rtol=1e-5)
    assert jnp.allclose(policy, ref_policy, atol=1e-5, rtol=1e-5)

    print("KERNEL_OK")
</pallas_src>

<mosaic_0001>
module attributes {stable_mosaic.version = 11 : i64} {
  func.func @_grpo_mla_kernel(%arg0: memref<64x128xf32, #tpu.memory_space<vmem>>, %arg1: memref<128x128xf32, #tpu.memory_space<vmem>>, %arg2: memref<1x128xf32, #tpu.memory_space<vmem>>, %arg3: memref<128x128xf32, #tpu.memory_space<vmem>>, %arg4: memref<128x128xf32, #tpu.memory_space<vmem>>, %arg5: memref<1x128xf32, #tpu.memory_space<vmem>>, %arg6: memref<8x128xf32, #tpu.memory_space<vmem>>, %arg7: memref<64x128xf32, #tpu.memory_space<vmem>>) attributes {dimension_semantics = [], scalar_prefetch = 0 : i64, scratch_operands = 1 : i64, tpu.core_type = #tpu.core_type<tc>} {
    %c0 = arith.constant 0 : index
    %c0_0 = arith.constant 0 : index
    %0 = vector.load %arg0[%c0, %c0_0] : memref<64x128xf32, #tpu.memory_space<vmem>>, vector<64x128xf32>
    %c0_1 = arith.constant 0 : index
    %c0_2 = arith.constant 0 : index
    %1 = vector.load %arg1[%c0_1, %c0_2] : memref<128x128xf32, #tpu.memory_space<vmem>>, vector<128x128xf32>
    %cst = arith.constant dense<0.000000e+00> : vector<64x128xf32>
    %2 = tpu.matmul %0, %1, %cst {dimension_numbers = #tpu.dot_dimension_numbers<[1], [0], [0], [1], [0, 0, 1, 1], [], []>} : vector<64x128xf32>, vector<128x128xf32>, vector<64x128xf32> -> vector<64x128xf32>
    %c0_3 = arith.constant 0 : index
    %c0_4 = arith.constant 0 : index
    %3 = vector.load %arg2[%c0_3, %c0_4] : memref<1x128xf32, #tpu.memory_space<vmem>>, vector<1x128xf32>
    %4 = vector.broadcast %3 : vector<1x128xf32> to vector<64x128xf32>
    %5 = arith.addf %2, %4 : vector<64x128xf32>
    %c0_5 = arith.constant 0 : index
    %c0_6 = arith.constant 0 : index
    %6 = vector.load %arg7[%c0_5, %c0_6] : memref<64x128xf32, #tpu.memory_space<vmem>>, vector<64x128xf32>
    tpu.vector_store %arg7[%c0_5, %c0_6], %5 {strides = array<i32>} : memref<64x128xf32, #tpu.memory_space<vmem>>, vector<64x128xf32>,
    %c0_7 = arith.constant 0 : index
    %c0_8 = arith.constant 0 : index
    %7 = vector.load %arg3[%c0_7, %c0_8] : memref<128x128xf32, #tpu.memory_space<vmem>>, vector<128x128xf32>
    %cst_9 = arith.constant 0.000000e+00 : f32
    %8 = vector.broadcast %cst_9 : f32 to vector<8x128xf32>
    %c0_i32 = arith.constant 0 : i32
    %c8_i32 = arith.constant 8 : i32
    %9 = arith.muli %c0_i32, %c8_i32 : i32
    %10 = tpu.assume_multiple %9, 8 : i32
    %11 = arith.index_cast %10 : i32 to index
    %c0_10 = arith.constant 0 : index
    %12 = vector.load %arg7[%11, %c0_10] : memref<64x128xf32, #tpu.memory_space<vmem>>, vector<8x128xf32>
    %cst_11 = arith.constant dense<0.000000e+00> : vector<8x128xf32>
    %13 = tpu.matmul %8, %7, %cst_11 {dimension_numbers = #tpu.dot_dimension_numbers<[1], [0], [0], [1], [0, 0, 1, 1], [], []>} : vector<8x128xf32>, vector<128x128xf32>, vector<8x128xf32> -> vector<8x128xf32>
    %14 = arith.addf %13, %12 : vector<8x128xf32>
    %cst_12 = arith.constant 0.000000e+00 : f32
    %15 = vector.broadcast %cst_12 : f32 to vector<8x128xf32>
    %16 = arith.maximumf %14, %15 : vector<8x128xf32>
    %c1_i32 = arith.constant 1 : i32
    %c8_i32_13 = arith.constant 8 : i32
    %17 = arith.muli %c1_i32, %c8_i32_13 : i32
    %18 = tpu.assume_multiple %17, 8 : i32
    %19 = arith.index_cast %18 : i32 to index
    %c0_14 = arith.constant 0 : index
    %20 = vector.load %arg7[%19, %c0_14] : memref<64x128xf32, #tpu.memory_space<vmem>>, vector<8x128xf32>
    %cst_15 = arith.constant dense<0.000000e+00> : vector<8x128xf32>
    %21 = tpu.matmul %16, %7, %cst_15 {dimension_numbers = #tpu.dot_dimension_numbers<[1], [0], [0], [1], [0, 0, 1, 1], [], []>} : vector<8x128xf32>, vector<128x128xf32>, vector<8x128xf32> -> vector<8x128xf32>
    %22 = arith.addf %21, %20 : vector<8x128xf32>
    %cst_16 = arith.constant 0.000000e+00 : f32
    %23 = vector.broadcast %cst_16 : f32 to vector<8x128xf32>
    %24 = arith.maximumf %22, %23 : vector<8x128xf32>
    %c2_i32 = arith.constant 2 : i32
    %c8_i32_17 = arith.constant 8 : i32
    %25 = arith.muli %c2_i32, %c8_i32_17 : i32
    %26 = tpu.assume_multiple %25, 8 : i32
    %27 = arith.index_cast %26 : i32 to index
    %c0_18 = arith.constant 0 : index
    %28 = vector.load %arg7[%27, %c0_18] : memref<64x128xf32, #tpu.memory_space<vmem>>, vector<8x128xf32>
    %cst_19 = arith.constant dense<0.000000e+00> : vector<8x128xf32>
    %29 = tpu.matmul %24, %7, %cst_19 {dimension_numbers = #tpu.dot_dimension_numbers<[1], [0], [0], [1], [0, 0, 1, 1], [], []>} : vector<8x128xf32>, vector<128x128xf32>, vector<8x128xf32> -> vector<8x128xf32>
    %30 = arith.addf %29, %28 : vector<8x128xf32>
    %cst_20 = arith.constant 0.000000e+00 : f32
    %31 = vector.broadcast %cst_20 : f32 to vector<8x128xf32>
    %32 = arith.maximumf %30, %31 : vector<8x128xf32>
    %c3_i32 = arith.constant 3 : i32
    %c8_i32_21 = arith.constant 8 : i32
    %33 = arith.muli %c3_i32, %c8_i32_21 : i32
    %34 = tpu.assume_multiple %33, 8 : i32
    %35 = arith.index_cast %34 : i32 to index
    %c0_22 = arith.constant 0 : index
    %36 = vector.load %arg7[%35, %c0_22] : memref<64x128xf32, #tpu.memory_space<vmem>>, vector<8x128xf32>
    %cst_23 = arith.constant dense<0.000000e+00> : vector<8x128xf32>
    %37 = tpu.matmul %32, %7, %cst_23 {dimension_numbers = #tpu.dot_dimension_numbers<[1], [0], [0], [1], [0, 0, 1, 1], [], []>} : vector<8x128xf32>, vector<128x128xf32>, vector<8x128xf32> -> vector<8x128xf32>
    %38 = arith.addf %37, %36 : vector<8x128xf32>
    %cst_24 = arith.constant 0.000000e+00 : f32
    %39 = vector.broadcast %cst_24 : f32 to vector<8x128xf32>
    %40 = arith.maximumf %38, %39 : vector<8x128xf32>
    %c4_i32 = arith.constant 4 : i32
    %c8_i32_25 = arith.constant 8 : i32
    %41 = arith.muli %c4_i32, %c8_i32_25 : i32
    %42 = tpu.assume_multiple %41, 8 : i32
    %43 = arith.index_cast %42 : i32 to index
    %c0_26 = arith.constant 0 : index
    %44 = vector.load %arg7[%43, %c0_26] : memref<64x128xf32, #tpu.memory_space<vmem>>, vector<8x128xf32>
    %cst_27 = arith.constant dense<0.000000e+00> : vector<8x128xf32>
    %45 = tpu.matmul %40, %7, %cst_27 {dimension_numbers = #tpu.dot_dimension_numbers<[1], [0], [0], [1], [0, 0, 1, 1], [], []>} : vector<8x128xf32>, vector<128x128xf32>, vector<8x128xf32> -> vector<8x128xf32>
    %46 = arith.addf %45, %44 : vector<8x128xf32>
    %cst_28 = arith.constant 0.000000e+00 : f32
    %47 = vector.broadcast %cst_28 : f32 to vector<8x128xf32>
    %48 = arith.maximumf %46, %47 : vector<8x128xf32>
    %c5_i32 = arith.constant 5 : i32
    %c8_i32_29 = arith.constant 8 : i32
    %49 = arith.muli %c5_i32, %c8_i32_29 : i32
    %50 = tpu.assume_multiple %49, 8 : i32
    %51 = arith.index_cast %50 : i32 to index
    %c0_30 = arith.constant 0 : index
    %52 = vector.load %arg7[%51, %c0_30] : memref<64x128xf32, #tpu.memory_space<vmem>>, vector<8x128xf32>
    %cst_31 = arith.constant dense<0.000000e+00> : vector<8x128xf32>
    %53 = tpu.matmul %48, %7, %cst_31 {dimension_numbers = #tpu.dot_dimension_numbers<[1], [0], [0], [1], [0, 0, 1, 1], [], []>} : vector<8x128xf32>, vector<128x128xf32>, vector<8x128xf32> -> vector<8x128xf32>
    %54 = arith.addf %53, %52 : vector<8x128xf32>
    %cst_32 = arith.constant 0.000000e+00 : f32
    %55 = vector.broadcast %cst_32 : f32 to vector<8x128xf32>
    %56 = arith.maximumf %54, %55 : vector<8x128xf32>
    %c6_i32 = arith.constant 6 : i32
    %c8_i32_33 = arith.constant 8 : i32
    %57 = arith.muli %c6_i32, %c8_i32_33 : i32
    %58 = tpu.assume_multiple %57, 8 : i32
    %59 = arith.index_cast %58 : i32 to index
    %c0_34 = arith.constant 0 : index
    %60 = vector.load %arg7[%59, %c0_34] : memref<64x128xf32, #tpu.memory_space<vmem>>, vector<8x128xf32>
    %cst_35 = arith.constant dense<0.000000e+00> : vector<8x128xf32>
    %61 = tpu.matmul %56, %7, %cst_35 {dimension_numbers = #tpu.dot_dimension_numbers<[1], [0], [0], [1], [0, 0, 1, 1], [], []>} : vector<8x128xf32>, vector<128x128xf32>, vector<8x128xf32> -> vector<8x128xf32>
    %62 = arith.addf %61, %60 : vector<8x128xf32>
    %cst_36 = arith.constant 0.000000e+00 : f32
    %63 = vector.broadcast %cst_36 : f32 to vector<8x128xf32>
    %64 = arith.maximumf %62, %63 : vector<8x128xf32>
    %c7_i32 = arith.constant 7 : i32
    %c8_i32_37 = arith.constant 8 : i32
    %65 = arith.muli %c7_i32, %c8_i32_37 : i32
    %66 = tpu.assume_multiple %65, 8 : i32
    %67 = arith.index_cast %66 : i32 to index
    %c0_38 = arith.constant 0 : index
    %68 = vector.load %arg7[%67, %c0_38] : memref<64x128xf32, #tpu.memory_space<vmem>>, vector<8x128xf32>
    %cst_39 = arith.constant dense<0.000000e+00> : vector<8x128xf32>
    %69 = tpu.matmul %64, %7, %cst_39 {dimension_numbers = #tpu.dot_dimension_numbers<[1], [0], [0], [1], [0, 0, 1, 1], [], []>} : vector<8x128xf32>, vector<128x128xf32>, vector<8x128xf32> -> vector<8x128xf32>
    %70 = arith.addf %69, %68 : vector<8x128xf32>
    %cst_40 = arith.constant 0.000000e+00 : f32
    %71 = vector.broadcast %cst_40 : f32 to vector<8x128xf32>
    %72 = arith.maximumf %70, %71 : vector<8x128xf32>
    %c8_i32_41 = arith.constant 8 : i32
    %c0_42 = arith.constant 0 : index
    %c0_43 = arith.constant 0 : index
    %73 = vector.load %arg4[%c0_42, %c0_43] : memref<128x128xf32, #tpu.memory_space<vmem>>, vector<128x128xf32>
    %cst_44 = arith.constant dense<0.000000e+00> : vector<8x128xf32>
    %74 = tpu.matmul %72, %73, %cst_44 {dimension_numbers = #tpu.dot_dimension_numbers<[1], [0], [0], [1], [0, 0, 1, 1], [], []>} : vector<8x128xf32>, vector<128x128xf32>, vector<8x128xf32> -> vector<8x128xf32>
    %c0_45 = arith.constant 0 : index
    %c0_46 = arith.constant 0 : index
    %75 = vector.load %arg5[%c0_45, %c0_46] : memref<1x128xf32, #tpu.memory_space<vmem>>, vector<1x128xf32>
    %76 = vector.broadcast %75 : vector<1x128xf32> to vector<8x128xf32>
    %77 = arith.addf %74, %76 : vector<8x128xf32>
    %c0_47 = arith.constant 0 : index
    %c0_48 = arith.constant 0 : index
    %78 = vector.load %arg6[%c0_47, %c0_48] : memref<8x128xf32, #tpu.memory_space<vmem>>, vector<8x128xf32>
    tpu.vector_store %arg6[%c0_47, %c0_48], %77 {strides = array<i32>} : memref<8x128xf32, #tpu.memory_space<vmem>>, vector<8x128xf32>,
    return
  }
}

</mosaic_0001>

<bundles_post_ra>
// kernel: tpu_custom_call.1
= control target key start
LH: loop header
LB: loop body
LE: loop exit
PB: predicated region body
PF: predicated region fallthrough
CT: control target
= control target key end

     0   :  { %11 = vsyncpa [#allocation4], 0  ;;  %s2013_s0 = inlined_call_operand.hbm [shape: f32[64,128], index: 0, kind: input, shape index: {}]   ;;  %s2014_s1 = inlined_call_operand.hbm [shape: f32[128,128], index: 1, kind: input, shape index: {}]   ;;  %s2015_s2 = inlined_call_operand.vmem [shape: f32[1,128], index: 2, kind: input, shape index: {}]   ;;  %s2016_s3 = inlined_call_operand.hbm [shape: f32[128,128], index: 3, kind: input, shape index: {}]   ;;  %s2017_s4 = inlined_call_operand.hbm [shape: f32[128,128], index: 4, kind: input, shape index: {}]   ;;  %s2018_s5 = inlined_call_operand.vmem [shape: f32[1,128], index: 5, kind: input, shape index: {}]   ;;  %s2019_s6 = inlined_call_operand.hbm [shape: f32[8,128], index: 6, kind: output, shape index: {}]  }
   0x1   :  { %12 = vsyncpa [#allocation7], 0 }
   0x2   :  { %13 = vsyncpa [#allocation10], 0 }
   0x3   :  { %14 = vsyncpa [#allocation5], 0  ;;  %s1588_s21 = smov [#allocation6]   ;;  %s1589_s23 = smov [#allocation3]  }
   0x4   :  { %s32_s22 = sshll.u32 %s1588_s21, 4  ;;  %s20_s24 = sshll.u32 %s1589_s23, 4  ;;  %s33_s22 = int_to_ptr.vmem [resolvable:$true] %s32_s22  ;;  %s21_s24 = int_to_ptr.vmem [resolvable:$true] %s20_s24 }
   0x5   :  { %s1488_s25 = scalar_lea.vmem %s33_s22, 2048  ;;  %p1493_p1 = scmp.lt.s32.totalorder %s33_s22, %s33_s22 }
   0x6   :  { %p1489_p0 = scmp.ne.s32.totalorder %s33_s22, %s1488_s25  ;;  %p1494_p2 = scmp.lt.s32.totalorder %s1488_s25, %s1488_s25 }
   0x8   :  { %p1495_p3 = por %p1494_p2, %p1493_p1 }
   0xa   :  { %p1496_p4 = pnand %p1495_p3, %p1489_p0 }
   0xc   :  { %1499 = shalt.err (!%p1496_p4)
}
   0xd   :  { %s1590_s26 = smov 128   ;;  %s1591_s27 = smov 8  }
   0xe   :  { %38 = dma.hbm_to_vmem [thread:$0]  %s2014_s1, 2048, %s33_s22, [#allocation7], %s1590_s26, %s1590_s26, %s1591_s27  }
   0xf   :  { %s1508_s30 = scalar_lea.vmem %s21_s24, 1024  ;;  %p1513_p6 = scmp.lt.s32.totalorder %s21_s24, %s21_s24 }
  0x10   :  { %p1509_p5 = scmp.ne.s32.totalorder %s21_s24, %s1508_s30  ;;  %p1514_p7 = scmp.lt.s32.totalorder %s1508_s30, %s1508_s30 }
  0x12   :  { %p1515_p8 = por %p1514_p7, %p1513_p6 }
  0x14   :  { %p1516_p9 = pnand %p1515_p8, %p1509_p5 }
  0x16   :  { %1519 = shalt.err (!%p1516_p9)
}
  0x17   :  { %26 = dma.hbm_to_vmem [thread:$0]  %s2013_s0, 1024, %s21_s24, [#allocation4], %s1590_s26, %s1590_s26, %s1591_s27  }
  0x18   :  { %s1592_s9 = smov [#allocation8]   ;;  %s1593_s11 = smov [#allocation9]  }
  0x19   :  { %s46_s10 = sshll.u32 %s1592_s9, 4  ;;  %s58_s12 = sshll.u32 %s1593_s11, 4  ;;  %s47_s10 = int_to_ptr.vmem [resolvable:$true] %s46_s10  ;;  %s59_s12 = int_to_ptr.vmem [resolvable:$true] %s58_s12 }
  0x1a   :  { %s1528_s1 = scalar_lea.vmem %s47_s10, 2048  ;;  %p1533_p11 = scmp.lt.s32.totalorder %s47_s10, %s47_s10 }
  0x1b   :  { %p1529_p10 = scmp.ne.s32.totalorder %s47_s10, %s1528_s1  ;;  %p1534_p12 = scmp.lt.s32.totalorder %s1528_s1, %s1528_s1 }
  0x1d   :  { %p1535_p13 = por %p1534_p12, %p1533_p11 }
  0x1f   :  { %p1536_p0 = pnand %p1535_p13, %p1529_p10 }
  0x21   :  { %1539 = shalt.err (!%p1536_p0)
}
  0x22   :  { %52 = dma.hbm_to_vmem [thread:$0]  %s2016_s3, 2048, %s47_s10, [#allocation7], %s1590_s26, %s1590_s26, %s1591_s27  }
  0x23   :  { %s1548_s0 = scalar_lea.vmem %s59_s12, 2048  ;;  %p1553_p2 = scmp.lt.s32.totalorder %s59_s12, %s59_s12 }
  0x24   :  { %p1549_p1 = scmp.ne.s32.totalorder %s59_s12, %s1548_s0  ;;  %p1554_p3 = scmp.lt.s32.totalorder %s1548_s0, %s1548_s0 }
  0x26   :  { %p1555_p4 = por %p1554_p3, %p1553_p2 }
  0x28   :  { %p1556_p5 = pnand %p1555_p4, %p1549_p1 }
  0x2a   :  { %1559 = shalt.err (!%p1556_p5)
}
  0x2b   :  { %64 = dma.hbm_to_vmem [thread:$0]  %s2017_s4, 2048, %s59_s12, [#allocation10], %s1590_s26, %s1590_s26, %s1591_s27  }
  0x2c   :  { %1580 = dma.done.wait [#allocation4], 1024  }
  0x2d   :  { %1581 = vsyncadd [#allocation4], 4294966272 }
  0x2e   :  { %1582 = dma.done.wait [#allocation7], 4096  }
  0x2f   :  { %1583 = vsyncadd [#allocation7], 4294963200 }
  0x30   :  { %1584 = dma.done.wait [#allocation10], 2048  }
  0x31   :  { %1585 = vsyncadd [#allocation10], 4294965248  ;;  %v1594_v0 = vmov 0.0   ;;  %vm1595_vm0 = vmmov 0   ;;  %v102_v1 = vld [vmem:[#allocation6 + $0x78] sm:$0xff]  ;;  %v101_v2 = vld [vmem:[#allocation6 + $0x70] sm:$0xff] }
  0x32   :  { %1156 = vmatprep.subr.mxu1 %v1594_v0  ;;  %1188 = vmatprep.mubr.msk.f32.mxu1 %vm1595_vm0, %v1594_v0  ;;  %v1659_v3 = vld [vmem:[#allocation8 + $0x78] sm:$0xff]  ;;  %v1662_v4 = vld [vmem:[#allocation8 + $0x70] sm:$0xff]  ;;  %v100_v5 = vld [vmem:[#allocation6 + $0x68] sm:$0xff]  ;;  %s1596_s18 = smov [#allocation11]  }
  0x33   :  { %1112 = vmatprep.subr.mxu0 %v102_v1  ;;  %1157 = vmatpush3.msra.mxu1 %v1659_v3  ;;  %v1665_v6 = vld [vmem:[#allocation8 + $0x68] sm:$0xff]  ;;  %v99_v7 = vld [vmem:[#allocation6 + $0x60] sm:$0xff]  ;;  %v98_v9 = vld [vmem:[#allocation6 + $0x58] sm:$0xff]  ;;  %s922_s19 = sshll.u32 %s1596_s18, 4  ;;  %s923_s19 = int_to_ptr.vmem [resolvable:$true] %s922_s19 }
  0x34   :  { %1113 = vmatpush3.msra.mxu0 %v102_v1  ;;  %1158 = vmatprep.subr.mxu1 %v1594_v0  ;;  %v1669_v8 = vld [vmem:[#allocation8 + $0x60] sm:$0xff]  ;;  %v1673_v10 = vld [vmem:[#allocation8 + $0x58] sm:$0xff]  ;;  %v97_v11 = vld [vmem:[#allocation6 + $0x50] sm:$0xff]  ;;  %s1560_s20 = scalar_lea.vmem %s923_s19, 128  ;;  %p1565_p7 = scmp.lt.s32.totalorder %s923_s19, %s923_s19 }
  0x35   :  { %1114 = vmatprep.subr.mxu0 %v101_v2  ;;  %1159 = vmatpush3.msra.mxu1 %v1662_v4  ;;  %v1677_v12 = vld [vmem:[#allocation8 + $0x50] sm:$0xff]  ;;  %v96_v13 = vld [vmem:[#allocation6 + $0x48] sm:$0xff]  ;;  %v95_v15 = vld [vmem:[#allocation6 + $0x40] sm:$0xff]  ;;  %p1561_p6 = scmp.ne.s32.totalorder %s923_s19, %s1560_s20  ;;  %p1566_p8 = scmp.lt.s32.totalorder %s1560_s20, %s1560_s20 }
  0x36   :  { %1115 = vmatpush3.msra.mxu0 %v101_v2  ;;  %1160 = vmatprep.subr.mxu1 %v1594_v0  ;;  %v1681_v14 = vld [vmem:[#allocation8 + $0x48] sm:$0xff]  ;;  %v1685_v16 = vld [vmem:[#allocation8 + $0x40] sm:$0xff]  ;;  %v94_v17 = vld [vmem:[#allocation6 + $0x38] sm:$0xff] }
  0x37   :  { %1116 = vmatprep.subr.mxu0 %v100_v5  ;;  %1161 = vmatpush3.msra.mxu1 %v1665_v6  ;;  %v1689_v18 = vld [vmem:[#allocation8 + $0x38] sm:$0xff]  ;;  %v93_v19 = vld [vmem:[#allocation6 + $0x30] sm:$0xff]  ;;  %v92_v21 = vld [vmem:[#allocation6 + $0x28] sm:$0xff]  ;;  %p1567_p9 = por %p1566_p8, %p1565_p7 }
  0x38   :  { %1117 = vmatpush3.msra.mxu0 %v100_v5  ;;  %1162 = vmatprep.subr.mxu1 %v1594_v0  ;;  %v1693_v20 = vld [vmem:[#allocation8 + $0x30] sm:$0xff]  ;;  %v1697_v22 = vld [vmem:[#allocation8 + $0x28] sm:$0xff]  ;;  %v91_v23 = vld [vmem:[#allocation6 + $0x20] sm:$0xff] }
  0x39   :  { %1118 = vmatprep.subr.mxu0 %v99_v7  ;;  %1163 = vmatpush3.msra.mxu1 %v1669_v8  ;;  %v1701_v24 = vld [vmem:[#allocation8 + $0x20] sm:$0xff]  ;;  %v90_v25 = vld [vmem:[#allocation6 + $0x18] sm:$0xff]  ;;  %v89_v27 = vld [vmem:[#allocation6 + $0x10] sm:$0xff]  ;;  %p1568_p10 = pnand %p1567_p9, %p1561_p6 }
  0x3a   :  { %1119 = vmatpush3.msra.mxu0 %v99_v7  ;;  %1164 = vmatprep.subr.mxu1 %v1594_v0  ;;  %v1705_v26 = vld [vmem:[#allocation8 + $0x18] sm:$0xff]  ;;  %v1709_v28 = vld [vmem:[#allocation8 + $0x10] sm:$0xff]  ;;  %v88_v29 = vld [vmem:[#allocation6 + $0x8] sm:$0xff] }
  0x3b   :  { %1120 = vmatprep.subr.mxu0 %v98_v9  ;;  %1165 = vmatpush3.msra.mxu1 %v1673_v10  ;;  %v79_v30 = vld [vmem:[#allocation3] sm:$0xff]  ;;  %v1714_v31 = vld [vmem:[#allocation8 + $0x8] sm:$0xff]  ;;  %v81_v35 = vld [vmem:[#allocation3 + $0x10] sm:$0xff] }
  0x3c   :  { %1121 = vmatpush3.msra.mxu0 %v98_v9  ;;  %1166 = vmatprep.subr.mxu1 %v1594_v0  ;;  %v87_v32 = vld [vmem:[#allocation6] sm:$0xff]  ;;  %v80_v34 = vld [vmem:[#allocation3 + $0x8] sm:$0xff]  ;;  %v82_v36 = vld [vmem:[#allocation3 + $0x18] sm:$0xff] }
  0x3d   :  { %1122 = vmatprep.subr.mxu0 %v97_v11  ;;  %1167 = vmatpush3.msra.mxu1 %v1677_v12  ;;  %v1717_v33 = vld [vmem:[#allocation8] sm:$0xff]  ;;  %v84_v38 = vld [vmem:[#allocation3 + $0x28] sm:$0xff]  ;;  %v85_v39 = vld [vmem:[#allocation3 + $0x30] sm:$0xff] }
  0x3e   :  { %1123 = vmatpush3.msra.mxu0 %v97_v11  ;;  %1168 = vmatprep.subr.mxu1 %v1594_v0  ;;  %v83_v37 = vld [vmem:[#allocation3 + $0x20] sm:$0xff]  ;;  %v86_v40 = vld [vmem:[#allocation3 + $0x38] sm:$0xff] }
  0x3f   :  { %1124 = vmatprep.subr.mxu0 %v96_v13  ;;  %1169 = vmatpush3.msra.mxu1 %v1681_v14  ;;  %v1796_v43 = vld [vmem:[%s2015_s2] ss:$0 sm:$0xff] }
  0x40   :  { %1125 = vmatpush3.msra.mxu0 %v96_v13  ;;  %1170 = vmatprep.subr.mxu1 %v1594_v0 }
  0x41   :  { %1126 = vmatprep.subr.mxu0 %v95_v15  ;;  %1171 = vmatpush3.msra.mxu1 %v1685_v16 }
  0x42   :  { %1127 = vmatpush3.msra.mxu0 %v95_v15  ;;  %1172 = vmatprep.subr.mxu1 %v1594_v0 }
  0x43   :  { %1128 = vmatprep.subr.mxu0 %v94_v17  ;;  %1173 = vmatpush3.msra.mxu1 %v1689_v18 }
  0x44   :  { %1129 = vmatpush3.msra.mxu0 %v94_v17  ;;  %1174 = vmatprep.subr.mxu1 %v1594_v0 }
  0x45   :  { %1130 = vmatprep.subr.mxu0 %v93_v19  ;;  %1175 = vmatpush3.msra.mxu1 %v1693_v20 }
  0x46   :  { %1131 = vmatpush3.msra.mxu0 %v93_v19  ;;  %1176 = vmatprep.subr.mxu1 %v1594_v0 }
  0x47   :  { %1132 = vmatprep.subr.mxu0 %v92_v21  ;;  %1177 = vmatpush3.msra.mxu1 %v1697_v22 }
  0x48   :  { %1133 = vmatpush3.msra.mxu0 %v92_v21  ;;  %1178 = vmatprep.subr.mxu1 %v1594_v0 }
  0x49   :  { %1134 = vmatprep.subr.mxu0 %v91_v23  ;;  %1179 = vmatpush3.msra.mxu1 %v1701_v24 }
  0x4a   :  { %1135 = vmatpush3.msra.mxu0 %v91_v23  ;;  %1180 = vmatprep.subr.mxu1 %v1594_v0  ;;  %v831_v23 = vld [vmem:[#allocation9 + $0x48] sm:$0xff] }
  0x4b   :  { %1136 = vmatprep.subr.mxu0 %v90_v25  ;;  %1181 = vmatpush3.msra.mxu1 %v1705_v26 }
  0x4c   :  { %1137 = vmatpush3.msra.mxu0 %v90_v25  ;;  %1182 = vmatprep.subr.mxu1 %v1594_v0  ;;  %v829_v25 = vld [vmem:[#allocation9 + $0x38] sm:$0xff] }
  0x4d   :  { %1138 = vmatprep.subr.mxu0 %v89_v27  ;;  %1183 = vmatpush3.msra.mxu1 %v1709_v28 }
  0x4e   :  { %1139 = vmatpush3.msra.mxu0 %v89_v27  ;;  %1184 = vmatprep.subr.mxu1 %v1594_v0  ;;  %v827_v27 = vld [vmem:[#allocation9 + $0x28] sm:$0xff] }
  0x4f   :  { %1140 = vmatprep.subr.mxu0 %v88_v29  ;;  %1144 = vmatprep.mubr.f32.mxu0 %v79_v30 }
  0x50   :  { %1141 = vmatpush3.msra.mxu0 %v88_v29  ;;  %1185 = vmatpush3.msra.mxu1 %v1714_v31  ;;  %v825_v29 = vld [vmem:[#allocation9 + $0x18] sm:$0xff] }
  0x51   :  { %1142 = vmatprep.subr.mxu0 %v87_v32  ;;  %1186 = vmatprep.subr.mxu1 %v1594_v0 }
  0x52   :  { %1143 = vmatpush3.msra.mxu0 %v87_v32  ;;  %1187 = vmatpush3.msra.mxu1 %v1717_v33 }
  0x53   :  { %1145 = vmatmul.mubr.f32.vlgmr.msra.gmra.mxu0 %v80_v34  ;;  %1189 = vmatmul.mubr.f32.vlgmr.msra.gmra.mxu1 %v1594_v0 }
  0x54   :  { %1191 = vmatprep.subr.mxu0 %v1594_v0  ;;  %1147 = vmatprep.mubr.f32.mxu0 %v81_v35  ;;  %v824_v35 = vld [vmem:[#allocation9 + $0x10] sm:$0xff] }
  0x55   :  { %1192 = vmatpush3.msra.mxu0 %v1659_v3  ;;  %1226 = vmatprep.subr.mxu1 %v1594_v0 }
  0x56   :  { %1193 = vmatprep.subr.mxu0 %v1594_v0  ;;  %1227 = vmatpush3.msra.mxu1 %v1659_v3 }
  0x57   :  { %1194 = vmatpush3.msra.mxu0 %v1662_v4  ;;  %1228 = vmatprep.subr.mxu1 %v1594_v0 }
  0x58   :  { %1195 = vmatprep.subr.mxu0 %v1594_v0  ;;  %1148 = vmatmul.mubr.f32.gmra.mxu0 %v82_v36  ;;  %v823_v36 = vld [vmem:[#allocation9 + $0x8] sm:$0xff] }
  0x59   :  { %1196 = vmatpush3.msra.mxu0 %v1665_v6  ;;  %1150 = vmatprep.mubr.f32.mxu0 %v83_v37  ;;  %v822_v37 = vld [vmem:[#allocation9] sm:$0xff] }
  0x5a   :  { %1197 = vmatprep.subr.mxu0 %v1594_v0  ;;  %1229 = vmatpush3.msra.mxu1 %v1662_v4 }
  0x5b   :  { %1198 = vmatpush3.msra.mxu0 %v1669_v8  ;;  %1230 = vmatprep.subr.mxu1 %v1594_v0 }
  0x5c   :  { %1199 = vmatprep.subr.mxu0 %v1594_v0  ;;  %1151 = vmatmul.mubr.f32.gmra.mxu0 %v84_v38 }
  0x5d   :  { %1200 = vmatpush3.msra.mxu0 %v1673_v10  ;;  %1231 = vmatpush3.msra.mxu1 %v1665_v6 }
  0x5e   :  { %1201 = vmatprep.subr.mxu0 %v1594_v0  ;;  %1232 = vmatprep.subr.mxu1 %v1594_v0 }
  0x5f   :  { %1202 = vmatpush3.msra.mxu0 %v1677_v12  ;;  %1233 = vmatpush3.msra.mxu1 %v1669_v8 }
  0x60   :  { %1203 = vmatprep.subr.mxu0 %v1594_v0  ;;  %1234 = vmatprep.subr.mxu1 %v1594_v0 }
  0x61   :  { %1204 = vmatpush3.msra.mxu0 %v1681_v14  ;;  %1235 = vmatpush3.msra.mxu1 %v1673_v10 }
  0x62   :  { %1205 = vmatprep.subr.mxu0 %v1594_v0  ;;  %1236 = vmatprep.subr.mxu1 %v1594_v0 }
  0x63   :  { %1206 = vmatpush3.msra.mxu0 %v1685_v16  ;;  %1237 = vmatpush3.msra.mxu1 %v1677_v12 }
  0x64   :  { %1207 = vmatprep.subr.mxu0 %v1594_v0  ;;  %1238 = vmatprep.subr.mxu1 %v1594_v0 }
  0x65   :  { %1208 = vmatpush3.msra.mxu0 %v1689_v18  ;;  %1239 = vmatpush3.msra.mxu1 %v1681_v14 }
  0x66   :  { %1209 = vmatprep.subr.mxu0 %v1594_v0  ;;  %1240 = vmatprep.subr.mxu1 %v1594_v0 }
  0x67   :  { %1210 = vmatpush3.msra.mxu0 %v1693_v20  ;;  %1241 = vmatpush3.msra.mxu1 %v1685_v16 }
  0x68   :  { %1211 = vmatprep.subr.mxu0 %v1594_v0  ;;  %1242 = vmatprep.subr.mxu1 %v1594_v0 }
  0x69   :  { %1212 = vmatpush3.msra.mxu0 %v1697_v22  ;;  %1243 = vmatpush3.msra.mxu1 %v1689_v18 }
  0x6a   :  { %1213 = vmatprep.subr.mxu0 %v1594_v0  ;;  %1244 = vmatprep.subr.mxu1 %v1594_v0 }
  0x6b   :  { %1214 = vmatpush3.msra.mxu0 %v1701_v24  ;;  %1245 = vmatpush3.msra.mxu1 %v1693_v20 }
  0x6c   :  { %1215 = vmatprep.subr.mxu0 %v1594_v0  ;;  %1246 = vmatprep.subr.mxu1 %v1594_v0 }
  0x6d   :  { %1216 = vmatpush3.msra.mxu0 %v1705_v26  ;;  %1247 = vmatpush3.msra.mxu1 %v1697_v22 }
  0x6e   :  { %1217 = vmatprep.subr.mxu0 %v1594_v0  ;;  %1248 = vmatprep.subr.mxu1 %v1594_v0 }
  0x6f   :  { %1218 = vmatpush3.msra.mxu0 %v1709_v28  ;;  %1249 = vmatpush3.msra.mxu1 %v1701_v24 }
  0x70   :  { %1219 = vmatprep.subr.mxu0 %v1594_v0  ;;  %1250 = vmatprep.subr.mxu1 %v1594_v0 }
  0x71   :  { %1220 = vmatpush3.msra.mxu0 %v1714_v31  ;;  %1251 = vmatpush3.msra.mxu1 %v1705_v26 }
  0x72   :  { %1221 = vmatprep.subr.mxu0 %v1594_v0  ;;  %1252 = vmatprep.subr.mxu1 %v1594_v0 }
  0x73   :  { %1222 = vmatpush3.msra.mxu0 %v1717_v33  ;;  %1253 = vmatpush3.msra.mxu1 %v1709_v28 }
  0x74   :  { %1254 = vmatprep.subr.mxu1 %v1594_v0  ;;  %1258 = vmatprep.mubr.msk.f32.mxu1 %vm1595_vm0, %v1594_v0 }
  0x75   :  { %1255 = vmatpush3.msra.mxu1 %v1714_v31  ;;  %1261 = vmatprep.subr.mxu0 %v1594_v0 }
  0x76   :  { %1256 = vmatprep.subr.mxu1 %v1594_v0  ;;  %1153 = vmatprep.mubr.f32.mxu0 %v85_v39 }
  0x77   :  { %1257 = vmatpush3.msra.mxu1 %v1717_v33  ;;  %1154 = vmatmul.mubr.f32.gmra.mxu0 %v86_v40 }
  0x78   :  { %1296 = vmatprep.subr.mxu1 %v1594_v0  ;;  %1223 = vmatprep.mubr.msk.f32.mxu0 %vm1595_vm0, %v1594_v0 }
 0x113   :  { %v1146_v41 = vpop.f32.mrf.mxu0  ;;  %v306_v42 = vpop.f32.mrf.mxu1 }
 0x114   :  { %v182_v55 = vadd.f32 %v1146_v41, %v1796_v43 }
 0x115   :  { %v176_v44 = vpop.f32.mrf.mxu0  ;;  %v1190_v45 = vpop.f32.mrf.mxu1 }
 0x116   :  { %v177_v46 = vadd.f32 %v1796_v43, %v176_v44  ;;  %v934_v44 = vld [vmem:[%s2018_s5] ss:$0 sm:$0xff] }
 0x118   :  { %v307_v47 = vadd.f32 %v306_v42, %v177_v46  ;;  %v1833_v49 = vpop.f32.mrf.mxu0 }
 0x119   :  { %v192_v2 = vadd.f32 %v1833_v49, %v1796_v43 }
 0x11a   :  { %v310_v48 = vmax.f32 %v307_v47, 0.0  ;;  %v186_v50 = vpop.f32.mrf.mxu0 }
 0x11b   :  { %v187_v60 = vadd.f32 %v1796_v43, %v186_v50 }
 0x11c   :  { %1224 = vmatmul.mubr.f32.vlgmr.msra.gmra.mxu0 %v310_v48  ;;  %v1835_v51 = vpop.f32.mrf.mxu0 }
 0x11d   :  { %1262 = vmatpush3.msra.mxu0 %v1659_v3  ;;  %1293 = vmatprep.mubr.msk.f32.mxu0 %vm1595_vm0, %v1594_v0 }
 0x11e   :  { %1263 = vmatprep.subr.mxu0 %v1594_v0  ;;  %v1837_v52 = vpop.f32.mrf.mxu0 }
 0x11f   :  { %1264 = vmatpush3.msra.mxu0 %v1662_v4  ;;  %v197_v13 = vadd.f32 %v1796_v43, %v1837_v52 }
 0x120   :  { %1265 = vmatprep.subr.mxu0 %v1594_v0 }
 0x121   :  { %1266 = vmatpush3.msra.mxu0 %v1665_v6 }
 0x122   :  { %1267 = vmatprep.subr.mxu0 %v1594_v0 }
 0x123   :  { %1268 = vmatpush3.msra.mxu0 %v1669_v8 }
 0x124   :  { %1269 = vmatprep.subr.mxu0 %v1594_v0 }
 0x125   :  { %1270 = vmatpush3.msra.mxu0 %v1673_v10 }
 0x126   :  { %1271 = vmatprep.subr.mxu0 %v1594_v0 }
 0x127   :  { %1272 = vmatpush3.msra.mxu0 %v1677_v12 }
 0x128   :  { %1273 = vmatprep.subr.mxu0 %v1594_v0 }
 0x129   :  { %1274 = vmatpush3.msra.mxu0 %v1681_v14 }
 0x12a   :  { %1275 = vmatprep.subr.mxu0 %v1594_v0 }
 0x12b   :  { %1276 = vmatpush3.msra.mxu0 %v1685_v16 }
 0x12c   :  { %1277 = vmatprep.subr.mxu0 %v1594_v0 }
 0x12d   :  { %1278 = vmatpush3.msra.mxu0 %v1689_v18 }
 0x12e   :  { %1279 = vmatprep.subr.mxu0 %v1594_v0 }
 0x12f   :  { %1280 = vmatpush3.msra.mxu0 %v1693_v20 }
 0x130   :  { %1281 = vmatprep.subr.mxu0 %v1594_v0 }
 0x131   :  { %1282 = vmatpush3.msra.mxu0 %v1697_v22 }
 0x132   :  { %1283 = vmatprep.subr.mxu0 %v1594_v0 }
 0x133   :  { %1284 = vmatpush3.msra.mxu0 %v1701_v24 }
 0x134   :  { %1285 = vmatprep.subr.mxu0 %v1594_v0 }
 0x135   :  { %1286 = vmatpush3.msra.mxu0 %v1705_v26 }
 0x136   :  { %1287 = vmatprep.subr.mxu0 %v1594_v0 }
 0x137   :  { %1288 = vmatpush3.msra.mxu0 %v1709_v28  ;;  %v1839_v53 = vpop.f32.mrf.mxu0 }
 0x138   :  { %1289 = vmatprep.subr.mxu0 %v1594_v0  ;;  %v212_v38 = vadd.f32 %v1839_v53, %v1796_v43 }
 0x139   :  { %1290 = vmatpush3.msra.mxu0 %v1714_v31  ;;  %v1841_v54 = vpop.f32.mrf.mxu0 }
 0x13a   :  { %1291 = vmatprep.subr.mxu0 %v1594_v0  ;;  %v207_v30 = vadd.f32 %v1796_v43, %v1841_v54 }
 0x13b   :  { %1292 = vmatpush3.msra.mxu0 %v1717_v33 }
 0x13c   :  { %1331 = vmatprep.subr.mxu0 %v1594_v0 }
 0x1dc   :  { %v379_v56 = vpop.f32.mrf.mxu0 }
 0x1dd   :  { %v380_v57 = vadd.f32 %v379_v56, %v182_v55 }
 0x1de   :  { %v1225_v58 = vpop.f32.mrf.mxu0 }
 0x1df   :  { %v383_v59 = vmax.f32 %v380_v57, 0.0 }
 0x1e1   :  { %1259 = vmatmul.mubr.f32.vlgmr.msra.gmra.mxu1 %v383_v59 }
 0x1e2   :  { %1297 = vmatpush3.msra.mxu1 %v1659_v3  ;;  %1328 = vmatprep.mubr.msk.f32.mxu1 %vm1595_vm0, %v1594_v0 }
 0x1e3   :  { %1298 = vmatprep.subr.mxu1 %v1594_v0 }
 0x1e4   :  { %1299 = vmatpush3.msra.mxu1 %v1662_v4 }
 0x1e5   :  { %1300 = vmatprep.subr.mxu1 %v1594_v0 }
 0x1e6   :  { %1301 = vmatpush3.msra.mxu1 %v1665_v6 }
 0x1e7   :  { %1302 = vmatprep.subr.mxu1 %v1594_v0 }
 0x1e8   :  { %1303 = vmatpush3.msra.mxu1 %v1669_v8 }
 0x1e9   :  { %1304 = vmatprep.subr.mxu1 %v1594_v0 }
 0x1ea   :  { %1305 = vmatpush3.msra.mxu1 %v1673_v10 }
 0x1eb   :  { %1306 = vmatprep.subr.mxu1 %v1594_v0 }
 0x1ec   :  { %1307 = vmatpush3.msra.mxu1 %v1677_v12 }
 0x1ed   :  { %1308 = vmatprep.subr.mxu1 %v1594_v0 }
 0x1ee   :  { %1309 = vmatpush3.msra.mxu1 %v1681_v14 }
 0x1ef   :  { %1310 = vmatprep.subr.mxu1 %v1594_v0 }
 0x1f0   :  { %1311 = vmatpush3.msra.mxu1 %v1685_v16 }
 0x1f1   :  { %1312 = vmatprep.subr.mxu1 %v1594_v0 }
 0x1f2   :  { %1313 = vmatpush3.msra.mxu1 %v1689_v18 }
 0x1f3   :  { %1314 = vmatprep.subr.mxu1 %v1594_v0 }
 0x1f4   :  { %1315 = vmatpush3.msra.mxu1 %v1693_v20 }
 0x1f5   :  { %1316 = vmatprep.subr.mxu1 %v1594_v0 }
 0x1f6   :  { %1317 = vmatpush3.msra.mxu1 %v1697_v22 }
 0x1f7   :  { %1318 = vmatprep.subr.mxu1 %v1594_v0 }
 0x1f8   :  { %1319 = vmatpush3.msra.mxu1 %v1701_v24 }
 0x1f9   :  { %1320 = vmatprep.subr.mxu1 %v1594_v0 }
 0x1fa   :  { %1321 = vmatpush3.msra.mxu1 %v1705_v26 }
 0x1fb   :  { %1322 = vmatprep.subr.mxu1 %v1594_v0 }
 0x1fc   :  { %1323 = vmatpush3.msra.mxu1 %v1709_v28 }
 0x1fd   :  { %1324 = vmatprep.subr.mxu1 %v1594_v0 }
 0x1fe   :  { %1325 = vmatpush3.msra.mxu1 %v1714_v31 }
 0x1ff   :  { %1326 = vmatprep.subr.mxu1 %v1594_v0 }
 0x200   :  { %1327 = vmatpush3.msra.mxu1 %v1717_v33 }
 0x201   :  { %1366 = vmatprep.subr.mxu1 %v1594_v0 }
 0x2a1   :  { %v452_v61 = vpop.f32.mrf.mxu1 }
 0x2a2   :  { %v453_v62 = vadd.f32 %v452_v61, %v187_v60 }
 0x2a3   :  { %v1260_v63 = vpop.f32.mrf.mxu1 }
 0x2a4   :  { %v456_v1 = vmax.f32 %v453_v62, 0.0 }
 0x2a6   :  { %1294 = vmatmul.mubr.f32.vlgmr.msra.gmra.mxu0 %v456_v1 }
 0x2a7   :  { %1332 = vmatpush3.msra.mxu0 %v1659_v3  ;;  %1363 = vmatprep.mubr.msk.f32.mxu0 %vm1595_vm0, %v1594_v0 }
 0x2a8   :  { %1333 = vmatprep.subr.mxu0 %v1594_v0 }
 0x2a9   :  { %1334 = vmatpush3.msra.mxu0 %v1662_v4 }
 0x2aa   :  { %1335 = vmatprep.subr.mxu0 %v1594_v0 }
 0x2ab   :  { %1336 = vmatpush3.msra.mxu0 %v1665_v6 }
 0x2ac   :  { %1337 = vmatprep.subr.mxu0 %v1594_v0 }
 0x2ad   :  { %1338 = vmatpush3.msra.mxu0 %v1669_v8 }
 0x2ae   :  { %1339 = vmatprep.subr.mxu0 %v1594_v0 }
 0x2af   :  { %1340 = vmatpush3.msra.mxu0 %v1673_v10 }
 0x2b0   :  { %1341 = vmatprep.subr.mxu0 %v1594_v0 }
 0x2b1   :  { %1342 = vmatpush3.msra.mxu0 %v1677_v12 }
 0x2b2   :  { %1343 = vmatprep.subr.mxu0 %v1594_v0 }
 0x2b3   :  { %1344 = vmatpush3.msra.mxu0 %v1681_v14 }
 0x2b4   :  { %1345 = vmatprep.subr.mxu0 %v1594_v0 }
 0x2b5   :  { %1346 = vmatpush3.msra.mxu0 %v1685_v16 }
 0x2b6   :  { %1347 = vmatprep.subr.mxu0 %v1594_v0 }
 0x2b7   :  { %1348 = vmatpush3.msra.mxu0 %v1689_v18 }
 0x2b8   :  { %1349 = vmatprep.subr.mxu0 %v1594_v0 }
 0x2b9   :  { %1350 = vmatpush3.msra.mxu0 %v1693_v20 }
 0x2ba   :  { %1351 = vmatprep.subr.mxu0 %v1594_v0 }
 0x2bb   :  { %1352 = vmatpush3.msra.mxu0 %v1697_v22 }
 0x2bc   :  { %1353 = vmatprep.subr.mxu0 %v1594_v0 }
 0x2bd   :  { %1354 = vmatpush3.msra.mxu0 %v1701_v24 }
 0x2be   :  { %1355 = vmatprep.subr.mxu0 %v1594_v0 }
 0x2bf   :  { %1356 = vmatpush3.msra.mxu0 %v1705_v26 }
 0x2c0   :  { %1357 = vmatprep.subr.mxu0 %v1594_v0 }
 0x2c1   :  { %1358 = vmatpush3.msra.mxu0 %v1709_v28 }
 0x2c2   :  { %1359 = vmatprep.subr.mxu0 %v1594_v0 }
 0x2c3   :  { %1360 = vmatpush3.msra.mxu0 %v1714_v31 }
 0x2c4   :  { %1361 = vmatprep.subr.mxu0 %v1594_v0 }
 0x2c5   :  { %1362 = vmatpush3.msra.mxu0 %v1717_v33 }
 0x2c6   :  { %1401 = vmatprep.subr.mxu0 %v1594_v0 }
 0x366   :  { %v525_v5 = vpop.f32.mrf.mxu0 }
 0x367   :  { %v526_v7 = vadd.f32 %v525_v5, %v192_v2 }
 0x368   :  { %v1295_v9 = vpop.f32.mrf.mxu0 }
 0x369   :  { %v529_v11 = vmax.f32 %v526_v7, 0.0 }
 0x36b   :  { %1329 = vmatmul.mubr.f32.vlgmr.msra.gmra.mxu1 %v529_v11 }
 0x36c   :  { %1367 = vmatpush3.msra.mxu1 %v1659_v3  ;;  %1398 = vmatprep.mubr.msk.f32.mxu1 %vm1595_vm0, %v1594_v0 }
 0x36d   :  { %1368 = vmatprep.subr.mxu1 %v1594_v0 }
 0x36e   :  { %1369 = vmatpush3.msra.mxu1 %v1662_v4 }
 0x36f   :  { %1370 = vmatprep.subr.mxu1 %v1594_v0 }
 0x370   :  { %1371 = vmatpush3.msra.mxu1 %v1665_v6 }
 0x371   :  { %1372 = vmatprep.subr.mxu1 %v1594_v0 }
 0x372   :  { %1373 = vmatpush3.msra.mxu1 %v1669_v8 }
 0x373   :  { %1374 = vmatprep.subr.mxu1 %v1594_v0 }
 0x374   :  { %1375 = vmatpush3.msra.mxu1 %v1673_v10 }
 0x375   :  { %1376 = vmatprep.subr.mxu1 %v1594_v0 }
 0x376   :  { %1377 = vmatpush3.msra.mxu1 %v1677_v12 }
 0x377   :  { %1378 = vmatprep.subr.mxu1 %v1594_v0 }
 0x378   :  { %1379 = vmatpush3.msra.mxu1 %v1681_v14 }
 0x379   :  { %1380 = vmatprep.subr.mxu1 %v1594_v0 }
 0x37a   :  { %1381 = vmatpush3.msra.mxu1 %v1685_v16 }
 0x37b   :  { %1382 = vmatprep.subr.mxu1 %v1594_v0 }
 0x37c   :  { %1383 = vmatpush3.msra.mxu1 %v1689_v18 }
 0x37d   :  { %1384 = vmatprep.subr.mxu1 %v1594_v0 }
 0x37e   :  { %1385 = vmatpush3.msra.mxu1 %v1693_v20 }
 0x37f   :  { %1386 = vmatprep.subr.mxu1 %v1594_v0 }
 0x380   :  { %1387 = vmatpush3.msra.mxu1 %v1697_v22 }
 0x381   :  { %1388 = vmatprep.subr.mxu1 %v1594_v0 }
 0x382   :  { %1389 = vmatpush3.msra.mxu1 %v1701_v24 }
 0x383   :  { %1390 = vmatprep.subr.mxu1 %v1594_v0 }
 0x384   :  { %1391 = vmatpush3.msra.mxu1 %v1705_v26 }
 0x385   :  { %1392 = vmatprep.subr.mxu1 %v1594_v0 }
 0x386   :  { %1393 = vmatpush3.msra.mxu1 %v1709_v28 }
 0x387   :  { %1394 = vmatprep.subr.mxu1 %v1594_v0 }
 0x388   :  { %1395 = vmatpush3.msra.mxu1 %v1714_v31 }
 0x389   :  { %1396 = vmatprep.subr.mxu1 %v1594_v0 }
 0x38a   :  { %1397 = vmatpush3.msra.mxu1 %v1717_v33 }
 0x38b   :  { %1436 = vmatprep.subr.mxu1 %v1594_v0 }
 0x42b   :  { %v598_v15 = vpop.f32.mrf.mxu1 }
 0x42c   :  { %v599_v17 = vadd.f32 %v598_v15, %v197_v13 }
 0x42d   :  { %v1330_v19 = vpop.f32.mrf.mxu1 }
 0x42e   :  { %v602_v21 = vmax.f32 %v599_v17, 0.0 }
 0x430   :  { %1364 = vmatmul.mubr.f32.vlgmr.msra.gmra.mxu0 %v602_v21 }
 0x431   :  { %1402 = vmatpush3.msra.mxu0 %v1659_v3  ;;  %1433 = vmatprep.mubr.msk.f32.mxu0 %vm1595_vm0, %v1594_v0  ;;  %v202_v3 = vadd.f32 %v1835_v51, %v1796_v43 }
 0x432   :  { %1403 = vmatprep.subr.mxu0 %v1594_v0 }
 0x433   :  { %1404 = vmatpush3.msra.mxu0 %v1662_v4 }
 0x434   :  { %1405 = vmatprep.subr.mxu0 %v1594_v0 }
 0x435   :  { %1406 = vmatpush3.msra.mxu0 %v1665_v6 }
 0x436   :  { %1407 = vmatprep.subr.mxu0 %v1594_v0 }
 0x437   :  { %1408 = vmatpush3.msra.mxu0 %v1669_v8 }
 0x438   :  { %1409 = vmatprep.subr.mxu0 %v1594_v0 }
 0x439   :  { %1410 = vmatpush3.msra.mxu0 %v1673_v10 }
 0x43a   :  { %1411 = vmatprep.subr.mxu0 %v1594_v0 }
 0x43b   :  { %1412 = vmatpush3.msra.mxu0 %v1677_v12  ;;  %v837_v12 = vld [vmem:[#allocation9 + $0x78] sm:$0xff] }
 0x43c   :  { %1413 = vmatprep.subr.mxu0 %v1594_v0 }
 0x43d   :  { %1414 = vmatpush3.msra.mxu0 %v1681_v14  ;;  %v836_v14 = vld [vmem:[#allocation9 + $0x70] sm:$0xff] }
 0x43e   :  { %1415 = vmatprep.subr.mxu0 %v1594_v0 }
 0x43f   :  { %1416 = vmatpush3.msra.mxu0 %v1685_v16  ;;  %v835_v16 = vld [vmem:[#allocation9 + $0x68] sm:$0xff] }
 0x440   :  { %1417 = vmatprep.subr.mxu0 %v1594_v0 }
 0x441   :  { %1418 = vmatpush3.msra.mxu0 %v1689_v18  ;;  %v834_v18 = vld [vmem:[#allocation9 + $0x60] sm:$0xff] }
 0x442   :  { %1419 = vmatprep.subr.mxu0 %v1594_v0 }
 0x443   :  { %1420 = vmatpush3.msra.mxu0 %v1693_v20  ;;  %v833_v20 = vld [vmem:[#allocation9 + $0x58] sm:$0xff] }
 0x444   :  { %1421 = vmatprep.subr.mxu0 %v1594_v0 }
 0x445   :  { %1422 = vmatpush3.msra.mxu0 %v1697_v22  ;;  %v832_v22 = vld [vmem:[#allocation9 + $0x50] sm:$0xff] }
 0x446   :  { %1423 = vmatprep.subr.mxu0 %v1594_v0 }
 0x447   :  { %1424 = vmatpush3.msra.mxu0 %v1701_v24  ;;  %v830_v24 = vld [vmem:[#allocation9 + $0x40] sm:$0xff] }
 0x448   :  { %1425 = vmatprep.subr.mxu0 %v1594_v0 }
 0x449   :  { %1426 = vmatpush3.msra.mxu0 %v1705_v26  ;;  %v828_v26 = vld [vmem:[#allocation9 + $0x30] sm:$0xff] }
 0x44a   :  { %1427 = vmatprep.subr.mxu0 %v1594_v0 }
 0x44b   :  { %1428 = vmatpush3.msra.mxu0 %v1709_v28  ;;  %v826_v28 = vld [vmem:[#allocation9 + $0x20] sm:$0xff] }
 0x44c   :  { %1429 = vmatprep.subr.mxu0 %v1594_v0 }
 0x44d   :  { %1430 = vmatpush3.msra.mxu0 %v1714_v31 }
 0x44e   :  { %1431 = vmatprep.subr.mxu0 %v1594_v0 }
 0x44f   :  { %1432 = vmatpush3.msra.mxu0 %v1717_v33 }
 0x4f0   :  { %v671_v4 = vpop.f32.mrf.mxu0 }
 0x4f1   :  { %v672_v6 = vadd.f32 %v671_v4, %v202_v3 }
 0x4f2   :  { %v1365_v8 = vpop.f32.mrf.mxu0 }
 0x4f3   :  { %v675_v10 = vmax.f32 %v672_v6, 0.0 }
 0x4f5   :  { %1399 = vmatmul.mubr.f32.vlgmr.msra.gmra.mxu1 %v675_v10 }
 0x4f6   :  { %1468 = vmatprep.mubr.msk.f32.mxu1 %vm1595_vm0, %v1594_v0  ;;  %1437 = vmatpush3.msra.mxu1 %v837_v12 }
 0x4f7   :  { %1438 = vmatprep.subr.mxu1 %v1594_v0 }
 0x4f8   :  { %1439 = vmatpush3.msra.mxu1 %v836_v14 }
 0x4f9   :  { %1440 = vmatprep.subr.mxu1 %v1594_v0 }
 0x4fa   :  { %1441 = vmatpush3.msra.mxu1 %v835_v16 }
 0x4fb   :  { %1442 = vmatprep.subr.mxu1 %v1594_v0 }
 0x4fc   :  { %1443 = vmatpush3.msra.mxu1 %v834_v18 }
 0x4fd   :  { %1444 = vmatprep.subr.mxu1 %v1594_v0 }
 0x4fe   :  { %1445 = vmatpush3.msra.mxu1 %v833_v20 }
 0x4ff   :  { %1446 = vmatprep.subr.mxu1 %v1594_v0 }
 0x500   :  { %1447 = vmatpush3.msra.mxu1 %v832_v22 }
 0x501   :  { %1448 = vmatprep.subr.mxu1 %v1594_v0 }
 0x502   :  { %1449 = vmatpush3.msra.mxu1 %v831_v23 }
 0x503   :  { %1450 = vmatprep.subr.mxu1 %v1594_v0 }
 0x504   :  { %1451 = vmatpush3.msra.mxu1 %v830_v24 }
 0x505   :  { %1452 = vmatprep.subr.mxu1 %v1594_v0 }
 0x506   :  { %1453 = vmatpush3.msra.mxu1 %v829_v25 }
 0x507   :  { %1454 = vmatprep.subr.mxu1 %v1594_v0 }
 0x508   :  { %1455 = vmatpush3.msra.mxu1 %v828_v26 }
 0x509   :  { %1456 = vmatprep.subr.mxu1 %v1594_v0 }
 0x50a   :  { %1457 = vmatpush3.msra.mxu1 %v827_v27 }
 0x50b   :  { %1458 = vmatprep.subr.mxu1 %v1594_v0 }
 0x50c   :  { %1459 = vmatpush3.msra.mxu1 %v826_v28 }
 0x50d   :  { %1460 = vmatprep.subr.mxu1 %v1594_v0 }
 0x50e   :  { %1461 = vmatpush3.msra.mxu1 %v825_v29 }
 0x50f   :  { %1462 = vmatprep.subr.mxu1 %v1594_v0 }
 0x510   :  { %1463 = vmatpush3.msra.mxu1 %v824_v35 }
 0x511   :  { %1464 = vmatprep.subr.mxu1 %v1594_v0 }
 0x512   :  { %1465 = vmatpush3.msra.mxu1 %v823_v36 }
 0x513   :  { %1466 = vmatprep.subr.mxu1 %v1594_v0 }
 0x514   :  { %1467 = vmatpush3.msra.mxu1 %v822_v37 }
 0x5b5   :  { %v744_v31 = vpop.f32.mrf.mxu1 }
 0x5b6   :  { %v745_v32 = vadd.f32 %v744_v31, %v207_v30 }
 0x5b7   :  { %v1400_v33 = vpop.f32.mrf.mxu1 }
 0x5b8   :  { %v748_v34 = vmax.f32 %v745_v32, 0.0 }
 0x5ba   :  { %1434 = vmatmul.mubr.f32.vlgmr.msra.gmra.mxu0 %v748_v34 }
 0x67a   :  { %v817_v39 = vpop.f32.mrf.mxu0 }
 0x67b   :  { %v818_v40 = vadd.f32 %v817_v39, %v212_v38 }
 0x67c   :  { %v1435_v41 = vpop.f32.mrf.mxu0 }
 0x67d   :  { %v821_v42 = vmax.f32 %v818_v40, 0.0 }
 0x67f   :  { %1469 = vmatmul.mubr.f32.vlgmr.msra.gmra.mxu1 %v821_v42 }
 0x73f   :  { %v911_v45 = vpop.f32.mrf.mxu1 }
 0x740   :  { %v912_v46 = vadd.f32 %v934_v44, %v911_v45 }
 0x741   :  { %v1470_v0 = vpop.f32.mrf.mxu1 }
 0x742   :  { %915 = vst [vmem:[#allocation11] sm:$0xff] %v912_v46 }
 0x743   :  { %1571 = shalt.err (!%p1568_p10)
}
 0x744   :  { %925 = dma.vmem_to_hbm [thread:$0]  %s923_s19, 128, %s2019_s6, [#allocation5]  }
 0x745   :  { %1586 = dma.done.wait [#allocation5], 128  }
 0x746   :  { %1587 = vsyncadd [#allocation5], 4294967168 }
 0x747   :  { %929 = vsyncpa [#allocation4], 1 }
 0x748   :  { %930 = vsyncpa [#allocation7], 1 }
 0x749   :  { %931 = vsyncpa [#allocation10], 1 }
 0x74a   :  { %932 = vsyncpa [#allocation5], 1 }

</bundles_post_ra>
